<compile_context>
chip_gen: v6e
topology: v6e:2x2x1
jax: 0.10.0
libtpu: 0.0.40
codegen_flags: <defaults>
</compile_context>

<pallas_src>
import functools
import math

import jax
import jax.numpy as jnp
from jax.experimental import pallas as pl
from jax.experimental.pallas import tpu as pltpu

# ----------------------------- config (mirrors the PyTorch globals) ----------
encoder_normalize_before = True
SIZE = 1
NUMBER_HEADS = 1
PROJECTION_SIZE = 1
DROPOUT_P = 1.0  # identity at inference


def _round_up(x, m):
    return ((x + m - 1) // m) * m


# ----------------------------- Pallas kernel --------------------------------
def _sdpa_kernel(q_ref, k_ref, v_ref, o_ref, *, scale, seq, head, flat,
                 mxu_dtype):
    """One grid step: a (batch_block, q_block, D) slab of the output."""
    if flat:
        # Lane-dense presentation: refs are (Bt, S*D) slabs; restore the
        # (S, D) structure for the matmuls (single in-VMEM relayout).
        bt = q_ref.shape[0]
        q = q_ref[...].reshape(bt, -1, head)
        k = k_ref[...].reshape(bt, seq, head)
        v = v_ref[...].reshape(bt, seq, head)
    else:
        q = q_ref[...]
        k = k_ref[...]
        v = v_ref[...]

    # Fold the scale into q: Sq*D multiplies instead of Sq*S on the scores.
    q = q.astype(jnp.float32) * scale

    # scores = q @ k^T per batch, contracting the last dims directly (no
    # explicit transpose of k -> no XLU transpose).  Operands are optionally
    # cast to bf16 for the MXU (v6e/v7x); accumulation stays f32.
    s = jnp.einsum("bqd,bkd->bqk", q.astype(mxu_dtype), k.astype(mxu_dtype),
                   preferred_element_type=jnp.float32)

    # Numerically-stable softmax over the last axis, all in f32 (VPU/EUP work
    # stays f32 on every generation -- v5e has no bf16 VPU/EUP).
    m = jnp.max(s, axis=-1, keepdims=True)
    p = jnp.exp(s - m)
    denom = jnp.sum(p, axis=-1, keepdims=True)

    # dropout: identity in eval mode.
    # TODO(synk): train-mode dropout (p=1 -> all-zero output) is not modeled.

    # o = (p @ v) / denom : normalize the small (Sq, D) output instead of the
    # (Sq, S) probabilities.  Exact divide -- the approx reciprocal is only
    # ~bf16 accurate and caused the previous correctness failure.
    o = jnp.einsum("bqk,bkd->bqd", p.astype(mxu_dtype), v.astype(mxu_dtype),
                   preferred_element_type=jnp.float32)
    o = o / denom

    if flat:
        o_ref[...] = o.reshape(o_ref.shape).astype(o_ref.dtype)
    else:
        o_ref[...] = o.astype(o_ref.dtype)


# ----------------------------- wrapper ---------------------------------------
def _vmem_budget():
    """Returns (scoped VMEM limit to request, per-step working-set budget)."""
    try:
        cap = pltpu.get_tpu_info().vmem_capacity_bytes
    except Exception:
        cap = 64 * 1024 * 1024  # conservative: v7x per-core physical VMEM
    limit = min(cap // 2, 32 * 1024 * 1024)   # ~32 MiB on v5e/v6e, ~32 on v7x
    return limit, int(0.7 * limit)            # keep headroom for the compiler


def sdpa_pallas(query, key, value, *, scale_factor, mxu_dtype=None,
                lane_dense="auto"):
    """query/key/value: (B, S, D).  Returns softmax(q k^T * scale) @ v."""
    B, S, D = query.shape
    assert key.shape == (B, S, D) and value.shape == (B, S, D)
    out_dtype = query.dtype
    if mxu_dtype is None:
        # Keep input precision by default (exact).  Pass jnp.bfloat16 on
        # v6e/v7x for 2-4x MXU throughput at realistic shapes.
        mxu_dtype = query.dtype
    itemsize = jnp.dtype(out_dtype).itemsize

    vmem_limit, budget = _vmem_budget()

    # Per-batch working set: q/o and k/v tiles are each double-buffered by the
    # pipeline (factor 4 per pair), plus ~3x the (q_block, S) score
    # intermediates (s, p, cast copy), all with (8,128)-padded lane widths.
    d_pad = _round_up(D, 128)
    s_lane = _round_up(S, 128)

    def per_batch_bytes(q_block):
        return (4 * q_block * d_pad + 4 * S * d_pad + 3 * q_block * s_lane) * 4

    # --- q split: keep the full sequence per block unless it can't fit ------
    q_block = S
    if per_batch_bytes(S) > budget:
        cands = [d for d in range(8, S, 8)
                 if S % d == 0 and per_batch_bytes(d) <= budget]
        if cands:
            q_block = max(cands)

    # --- batch block: as many batch rows per grid step as the budget allows -
    batch_block = max(1, budget // max(per_batch_bytes(q_block), 1))
    batch_block = min(batch_block, B)
    # v7x has two TensorCores: leave at least two grid steps on the batch axis
    # when there is enough work to be worth both cores.
    if B >= 2 and B * S * D * itemsize >= (1 << 20):
        batch_block = min(batch_block, -(-B // 2))

    # --- lane-dense presentation ---------------------------------------------
    # With D=16 every (.., D) tile wastes 7/8 of each vreg / VMEM tile and
    # every store is a masked vst.msk.  When S*D is a multiple of 128 present
    # q/k/v/out as (B, S*D) slabs (free row-major reshape outside the kernel)
    # so DMAs are contiguous and stores are full-lane.
    flat_ok = (q_block == S) and (S * D) % 128 == 0 and D % 128 != 0
    want_flat = flat_ok if lane_dense == "auto" else (bool(lane_dense) and flat_ok)
    if want_flat and batch_block < B and batch_block % 8 != 0:
        # 2-D slab blocks need a sublane-aligned batch block (or one block
        # spanning the whole, possibly padded, batch).
        rounded = (batch_block // 8) * 8
        if rounded >= 8:
            batch_block = rounded
        else:
            want_flat = False

    b_pad = _round_up(B, batch_block)
    grid_b = b_pad // batch_block

    def pad_b(x):
        if b_pad == B:
            return x
        return jnp.pad(x, ((0, b_pad - B), (0, 0), (0, 0)))

    q_p, k_p, v_p = pad_b(query), pad_b(key), pad_b(value)

    def run(flat):
        kernel = functools.partial(_sdpa_kernel, scale=float(scale_factor),
                                   seq=S, head=D, flat=flat,
                                   mxu_dtype=mxu_dtype)
        if flat:
            qf = q_p.reshape(b_pad, S * D)   # free row-major views
            kf = k_p.reshape(b_pad, S * D)
            vf = v_p.reshape(b_pad, S * D)
            spec = pl.BlockSpec((batch_block, S * D), lambda b: (b, 0))
            out = pl.pallas_call(
                kernel,
                out_shape=jax.ShapeDtypeStruct((b_pad, S * D), out_dtype),
                grid=(grid_b,),
                in_specs=[spec, spec, spec],
                out_specs=spec,
                compiler_params=pltpu.CompilerParams(
                    dimension_semantics=("parallel",),
                    vmem_limit_bytes=vmem_limit),
            )(qf, kf, vf)
            out = out.reshape(b_pad, S, D)
        else:
            q_spec = pl.BlockSpec((batch_block, q_block, D),
                                  lambda b, i: (b, i, 0))
            kv_spec = pl.BlockSpec((batch_block, S, D),
                                   lambda b, i: (b, 0, 0))
            out = pl.pallas_call(
                kernel,
                out_shape=jax.ShapeDtypeStruct((b_pad, S, D), out_dtype),
                grid=(grid_b, S // q_block),
                in_specs=[q_spec, kv_spec, kv_spec],
                out_specs=q_spec,
                # Batch is the preferred (megacore) parallel axis: sharding
                # the q axis would duplicate the K/V DMA into both cores.
                compiler_params=pltpu.CompilerParams(
                    dimension_semantics=("parallel", "arbitrary"),
                    vmem_limit_bytes=vmem_limit),
            )(q_p, k_p, v_p)
        return jax.block_until_ready(out)

    if want_flat:
        try:
            out = run(flat=True)
        except Exception:
            # Mosaic's in-kernel (S*D) <-> (S, D) relayout is shape/generation
            # dependent; fall back to the plain 3-D tile layout if rejected.
            out = run(flat=False)
    else:
        out = run(flat=False)

    return out[:B] if b_pad != B else out


# ----------------------------- Model wrapper ---------------------------------
class ModelPallas:
    def __init__(self, size, number_heads, projection_size, dropout_p, rng_key):
        self.size = size
        self.number_heads = number_heads
        self.projection_size = projection_size
        self.dropout_p = dropout_p
        self.scale_factor = 1.0
        if encoder_normalize_before:
            self.scale_factor = self.scale_factor / (
                self.number_heads * math.sqrt(self.size))
        # nn.Linear(size, projection_size, bias=False) weight -- built for
        # fidelity with __init__ but never used in forward (matches the spec).
        bound = 1.0 / math.sqrt(size)
        self.projection_weight = jax.random.uniform(
            rng_key, (projection_size, size), jnp.float32, -bound, bound)

    def __call__(self, query, key, value, mask=None, *, mxu_dtype=None):
        return sdpa_pallas(query, key, value, scale_factor=self.scale_factor,
                           mxu_dtype=mxu_dtype)


# ----------------------------- reference (plain JAX) -------------------------
def _reference(query, key, value, scale_factor, operand_dtype=None):
    hi = jax.lax.Precision.HIGHEST
    if operand_dtype is None:
        s = jnp.einsum("bqd,bkd->bqk", query, key, precision=hi) * scale_factor
        p = jax.nn.softmax(s, axis=-1)
        return jnp.einsum("bqk,bkd->bqd", p, value, precision=hi)
    q = (query.astype(jnp.float32) * scale_factor).astype(operand_dtype)
    s = jnp.einsum("bqd,bkd->bqk", q, key.astype(operand_dtype),
                   preferred_element_type=jnp.float32)
    p = jax.nn.softmax(s, axis=-1)
    return jnp.einsum("bqk,bkd->bqd", p.astype(operand_dtype),
                      value.astype(operand_dtype),
                      preferred_element_type=jnp.float32)


if __name__ == "__main__":
    root = jax.random.PRNGKey(0)
    k_q, k_k, k_v, k_w = jax.random.split(root, 4)

    # Shapes from the module's globals: (1, 32, 16)
    B, S, D = 1, 32, 16
    query = jax.random.normal(k_q, (B, S, D), jnp.float32)
    key = jax.random.normal(k_k, (B, S, D), jnp.float32)
    value = jax.random.normal(k_v, (B, S, D), jnp.float32)

    model = ModelPallas(SIZE, NUMBER_HEADS, PROJECTION_SIZE, DROPOUT_P, k_w)

    # f32 path (exact softmax, exact divide).  Tolerance leaves margin for
    # MXU f32 multi-pass rounding on hardware; interpret agreement is ~1e-6.
    out = jax.block_until_ready(model(query, key, value))
    ref = _reference(query, key, value, model.scale_factor)
    assert out.shape == (B, S, D)
    assert jnp.allclose(out, ref, atol=2e-3, rtol=2e-3), "f32 mismatch vs reference"

    # bf16 MXU-operand path (review recommendation for v6e/v7x); softmax and
    # normalization stay f32, so it is checked against a bf16-operand ref.
    out_bf16 = jax.block_until_ready(
        model(query, key, value, mxu_dtype=jnp.bfloat16))
    ref_bf16 = _reference(query, key, value, model.scale_factor,
                          operand_dtype=jnp.bfloat16)
    assert jnp.allclose(out_bf16, ref_bf16, atol=1e-2, rtol=1e-2), \
        "bf16 mismatch vs bf16 reference"

    # A slightly larger shape exercising the lane-dense slab layout with more
    # than one batch row per block.
    B2, S2, D2 = 4, 128, 16
    q2 = jax.random.normal(jax.random.PRNGKey(1), (B2, S2, D2), jnp.float32)
    k2 = jax.random.normal(jax.random.PRNGKey(2), (B2, S2, D2), jnp.float32)
    v2 = jax.random.normal(jax.random.PRNGKey(3), (B2, S2, D2), jnp.float32)
    out2 = jax.block_until_ready(model(q2, k2, v2))
    ref2 = _reference(q2, k2, v2, model.scale_factor)
    assert jnp.allclose(out2, ref2, atol=2e-3, rtol=2e-3), "mismatch (4,128,16)"

    print("KERNEL_OK")
</pallas_src>

<mosaic_0001>
module attributes {stable_mosaic.version = 11 : i64} {
  func.func @_sdpa_kernel(%arg0: i32, %arg1: memref<1x512xf32, #tpu.memory_space<vmem>>, %arg2: memref<1x512xf32, #tpu.memory_space<vmem>>, %arg3: memref<1x512xf32, #tpu.memory_space<vmem>>, %arg4: memref<1x512xf32, #tpu.memory_space<vmem>>) attributes {dimension_semantics = [#tpu.dimension_semantics<parallel>], iteration_bounds = array<i64: 1>, scalar_prefetch = 0 : i64, scratch_operands = 0 : i64, tpu.core_type = #tpu.core_type<tc>, window_params = [{transform_indices = @transform_0, window_bounds = array<i64: 1, 512>}, {transform_indices = @transform_1, window_bounds = array<i64: 1, 512>}, {transform_indices = @transform_2, window_bounds = array<i64: 1, 512>}, {transform_indices = @transform_3, window_bounds = array<i64: 1, 512>}]} {
    %c0 = arith.constant 0 : index
    %c0_0 = arith.constant 0 : index
    %0 = vector.load %arg1[%c0, %c0_0] : memref<1x512xf32, #tpu.memory_space<vmem>>, vector<1x512xf32>
    %1 = vector.shape_cast %0 : vector<1x512xf32> to vector<1x32x16xf32>
    %c0_1 = arith.constant 0 : index
    %c0_2 = arith.constant 0 : index
    %2 = vector.load %arg2[%c0_1, %c0_2] : memref<1x512xf32, #tpu.memory_space<vmem>>, vector<1x512xf32>
    %3 = vector.shape_cast %2 : vector<1x512xf32> to vector<1x32x16xf32>
    %c0_3 = arith.constant 0 : index
    %c0_4 = arith.constant 0 : index
    %4 = vector.load %arg3[%c0_3, %c0_4] : memref<1x512xf32, #tpu.memory_space<vmem>>, vector<1x512xf32>
    %5 = vector.shape_cast %4 : vector<1x512xf32> to vector<1x32x16xf32>
    %cst = arith.constant 1.000000e+00 : f32
    %6 = vector.broadcast %cst : f32 to vector<1x32x16xf32>
    %7 = arith.mulf %1, %6 : vector<1x32x16xf32>
    "tpu.trace_start"() <{level = 10 : i32, message = "bqd,bkd->bqk"}> : () -> ()
    %cst_5 = arith.constant dense<0.000000e+00> : vector<1x32x32xf32>
    %8 = tpu.matmul %7, %3, %cst_5 {dimension_numbers = #tpu.dot_dimension_numbers<[2], [2], [1], [1], [0, 0, 0, 1, 1, 1], [0], [0]>} : vector<1x32x16xf32>, vector<1x32x16xf32>, vector<1x32x32xf32> -> vector<1x32x32xf32>
    "tpu.trace_stop"() : () -> ()
    %cst_6 = arith.constant dense<0xFF800000> : vector<1x32xf32>
    %9 = vector.multi_reduction <maximumf>, %8, %cst_6 [2] : vector<1x32x32xf32> to vector<1x32xf32>
    %10 = vector.shape_cast %9 : vector<1x32xf32> to vector<1x32x1xf32>
    %11 = vector.broadcast %10 : vector<1x32x1xf32> to vector<1x32x32xf32>
    %12 = arith.subf %8, %11 : vector<1x32x32xf32>
    %13 = math.exp %12 : vector<1x32x32xf32>
    %cst_7 = arith.constant dense<0.000000e+00> : vector<1x32xf32>
    %14 = vector.multi_reduction <add>, %13, %cst_7 [2] : vector<1x32x32xf32> to vector<1x32xf32>
    %15 = vector.shape_cast %14 : vector<1x32xf32> to vector<1x32x1xf32>
    "tpu.trace_start"() <{level = 10 : i32, message = "bqk,bkd->bqd"}> : () -> ()
    %cst_8 = arith.constant dense<0.000000e+00> : vector<1x32x16xf32>
    %16 = tpu.matmul %13, %5, %cst_8 {dimension_numbers = #tpu.dot_dimension_numbers<[2], [1], [1], [2], [0, 0, 0, 1, 1, 2], [0], [0]>} : vector<1x32x32xf32>, vector<1x32x16xf32>, vector<1x32x16xf32> -> vector<1x32x16xf32>
    "tpu.trace_stop"() : () -> ()
    %17 = vector.broadcast %15 : vector<1x32x1xf32> to vector<1x32x16xf32>
    %18 = arith.divf %16, %17 : vector<1x32x16xf32>
    %19 = vector.shape_cast %18 : vector<1x32x16xf32> to vector<1x512xf32>
    %c0_9 = arith.constant 0 : index
    %c0_10 = arith.constant 0 : index
    %20 = vector.load %arg4[%c0_9, %c0_10] : memref<1x512xf32, #tpu.memory_space<vmem>>, vector<1x512xf32>
    tpu.vector_store %arg4[%c0_9, %c0_10], %19 {strides = array<i32>} : memref<1x512xf32, #tpu.memory_space<vmem>>, vector<1x512xf32>,
    return
  }
  func.func @transform_0(%arg0: i32) -> (i32, i32) {
    %c0_i32 = arith.constant 0 : i32
    %c0_i32_0 = arith.constant 0 : i32
    return %arg0, %c0_i32 : i32, i32
  }
  func.func @transform_1(%arg0: i32) -> (i32, i32) {
    %c0_i32 = arith.constant 0 : i32
    %c0_i32_0 = arith.constant 0 : i32
    return %arg0, %c0_i32 : i32, i32
  }
  func.func @transform_2(%arg0: i32) -> (i32, i32) {
    %c0_i32 = arith.constant 0 : i32
    %c0_i32_0 = arith.constant 0 : i32
    return %arg0, %c0_i32 : i32, i32
  }
  func.func @transform_3(%arg0: i32) -> (i32, i32) {
    %c0_i32 = arith.constant 0 : i32
    %c0_i32_0 = arith.constant 0 : i32
    return %arg0, %c0_i32 : i32, i32
  }
}

module attributes {stable_mosaic.version = 11 : i64} {
  func.func @_sdpa_kernel(%arg0: i32, %arg1: i32, %arg2: memref<1x32x16xf32, #tpu.memory_space<vmem>>, %arg3: memref<1x32x16xf32, #tpu.memory_space<vmem>>, %arg4: memref<1x32x16xf32, #tpu.memory_space<vmem>>, %arg5: memref<1x32x16xf32, #tpu.memory_space<vmem>>) attributes {dimension_semantics = [#tpu.dimension_semantics<parallel>, #tpu.dimension_semantics<arbitrary>], iteration_bounds = array<i64: 1, 1>, scalar_prefetch = 0 : i64, scratch_operands = 0 : i64, tpu.core_type = #tpu.core_type<tc>, window_params = [{transform_indices = @transform_0, window_bounds = array<i64: 1, 32, 16>}, {transform_indices = @transform_1, window_bounds = array<i64: 1, 32, 16>}, {transform_indices = @transform_2, window_bounds = array<i64: 1, 32, 16>}, {transform_indices = @transform_3, window_bounds = array<i64: 1, 32, 16>}]} {
    %c0 = arith.constant 0 : index
    %c0_0 = arith.constant 0 : index
    %c0_1 = arith.constant 0 : index
    %0 = vector.load %arg2[%c0, %c0_0, %c0_1] : memref<1x32x16xf32, #tpu.memory_space<vmem>>, vector<1x32x16xf32>
    %c0_2 = arith.constant 0 : index
    %c0_3 = arith.constant 0 : index
    %c0_4 = arith.constant 0 : index
    %1 = vector.load %arg3[%c0_2, %c0_3, %c0_4] : memref<1x32x16xf32, #tpu.memory_space<vmem>>, vector<1x32x16xf32>
    %c0_5 = arith.constant 0 : index
    %c0_6 = arith.constant 0 : index
    %c0_7 = arith.constant 0 : index
    %2 = vector.load %arg4[%c0_5, %c0_6, %c0_7] : memref<1x32x16xf32, #tpu.memory_space<vmem>>, vector<1x32x16xf32>
    %cst = arith.constant 1.000000e+00 : f32
    %3 = vector.broadcast %cst : f32 to vector<1x32x16xf32>
    %4 = arith.mulf %0, %3 : vector<1x32x16xf32>
    "tpu.trace_start"() <{level = 10 : i32, message = "bqd,bkd->bqk"}> : () -> ()
    %cst_8 = arith.constant dense<0.000000e+00> : vector<1x32x32xf32>
    %5 = tpu.matmul %4, %1, %cst_8 {dimension_numbers = #tpu.dot_dimension_numbers<[2], [2], [1], [1], [0, 0, 0, 1, 1, 1], [0], [0]>} : vector<1x32x16xf32>, vector<1x32x16xf32>, vector<1x32x32xf32> -> vector<1x32x32xf32>
    "tpu.trace_stop"() : () -> ()
    %cst_9 = arith.constant dense<0xFF800000> : vector<1x32xf32>
    %6 = vector.multi_reduction <maximumf>, %5, %cst_9 [2] : vector<1x32x32xf32> to vector<1x32xf32>
    %7 = vector.shape_cast %6 : vector<1x32xf32> to vector<1x32x1xf32>
    %8 = vector.broadcast %7 : vector<1x32x1xf32> to vector<1x32x32xf32>
    %9 = arith.subf %5, %8 : vector<1x32x32xf32>
    %10 = math.exp %9 : vector<1x32x32xf32>
    %cst_10 = arith.constant dense<0.000000e+00> : vector<1x32xf32>
    %11 = vector.multi_reduction <add>, %10, %cst_10 [2] : vector<1x32x32xf32> to vector<1x32xf32>
    %12 = vector.shape_cast %11 : vector<1x32xf32> to vector<1x32x1xf32>
    "tpu.trace_start"() <{level = 10 : i32, message = "bqk,bkd->bqd"}> : () -> ()
    %cst_11 = arith.constant dense<0.000000e+00> : vector<1x32x16xf32>
    %13 = tpu.matmul %10, %2, %cst_11 {dimension_numbers = #tpu.dot_dimension_numbers<[2], [1], [1], [2], [0, 0, 0, 1, 1, 2], [0], [0]>} : vector<1x32x32xf32>, vector<1x32x16xf32>, vector<1x32x16xf32> -> vector<1x32x16xf32>
    "tpu.trace_stop"() : () -> ()
    %14 = vector.broadcast %12 : vector<1x32x1xf32> to vector<1x32x16xf32>
    %15 = arith.divf %13, %14 : vector<1x32x16xf32>
    %c0_12 = arith.constant 0 : index
    %c0_13 = arith.constant 0 : index
    %c0_14 = arith.constant 0 : index
    %16 = vector.load %arg5[%c0_12, %c0_13, %c0_14] : memref<1x32x16xf32, #tpu.memory_space<vmem>>, vector<1x32x16xf32>
    tpu.vector_store %arg5[%c0_12, %c0_13, %c0_14], %15 {strides = array<i32>} : memref<1x32x16xf32, #tpu.memory_space<vmem>>, vector<1x32x16xf32>,
    return
  }
  func.func @transform_0(%arg0: i32, %arg1: i32) -> (i32, i32, i32) {
    %c0_i32 = arith.constant 0 : i32
    %c0_i32_0 = arith.constant 0 : i32
    return %arg0, %arg1, %c0_i32 : i32, i32, i32
  }
  func.func @transform_1(%arg0: i32, %arg1: i32) -> (i32, i32, i32) {
    %c0_i32 = arith.constant 0 : i32
    %c0_i32_0 = arith.constant 0 : i32
    %c0_i32_1 = arith.constant 0 : i32
    return %arg0, %c0_i32, %c0_i32_0 : i32, i32, i32
  }
  func.func @transform_2(%arg0: i32, %arg1: i32) -> (i32, i32, i32) {
    %c0_i32 = arith.constant 0 : i32
    %c0_i32_0 = arith.constant 0 : i32
    %c0_i32_1 = arith.constant 0 : i32
    return %arg0, %c0_i32, %c0_i32_0 : i32, i32, i32
  }
  func.func @transform_3(%arg0: i32, %arg1: i32) -> (i32, i32, i32) {
    %c0_i32 = arith.constant 0 : i32
    %c0_i32_0 = arith.constant 0 : i32
    return %arg0, %arg1, %c0_i32 : i32, i32, i32
  }
}

</mosaic_0001>

<bundles_post_ra>
// kernel: tpu_custom_call.1
= control target key start
LH: loop header
LB: loop body
LE: loop exit
PB: predicated region body
PF: predicated region fallthrough
CT: control target
= control target key end

     0   :  { %8 = vsyncpa [#allocation3], 0  ;;  %s2008_s0 = inlined_call_operand.hbm [shape: f32[1,512], index: 0, kind: input, shape index: {}]   ;;  %s2009_s1 = inlined_call_operand.hbm [shape: f32[1,512], index: 1, kind: input, shape index: {}]   ;;  %s2010_s2 = inlined_call_operand.hbm [shape: f32[1,512], index: 2, kind: input, shape index: {}]   ;;  %s2011_s3 = inlined_call_operand.hbm [shape: f32[1,512], index: 3, kind: output, shape index: {}]  }
   0x1   :  { %9 = vsyncpa [#allocation6], 0 }
   0x2   :  { %10 = vsyncpa [#allocation4], 0  ;;  %s1570_s12 = smov [#allocation5]   ;;  %s1571_s14 = smov [#allocation2]  }
   0x3   :  { %s27_s13 = sshll.u32 %s1570_s12, 4  ;;  %s17_s15 = sshll.u32 %s1571_s14, 4  ;;  %s28_s13 = int_to_ptr.vmem [resolvable:$true] %s27_s13  ;;  %s18_s15 = int_to_ptr.vmem [resolvable:$true] %s17_s15 }
   0x4   :  { %s1492_s16 = scalar_lea.vmem %s28_s13, 64  ;;  %p1497_p1 = scmp.lt.s32.totalorder %s28_s13, %s28_s13 }
   0x5   :  { %p1493_p0 = scmp.ne.s32.totalorder %s28_s13, %s1492_s16  ;;  %p1498_p2 = scmp.lt.s32.totalorder %s1492_s16, %s1492_s16 }
   0x7   :  { %p1499_p3 = por %p1498_p2, %p1497_p1 }
   0x9   :  { %p1500_p4 = pnand %p1499_p3, %p1493_p0 }
   0xb   :  { %1503 = shalt.err (!%p1500_p4)
}
   0xc   :  { %30 = dma.hbm_to_vmem [thread:$0]  %s2009_s1, 64, %s28_s13, [#allocation6]  }
   0xd   :  { %s1512_s19 = scalar_lea.vmem %s18_s15, 64  ;;  %p1517_p6 = scmp.lt.s32.totalorder %s18_s15, %s18_s15 }
   0xe   :  { %p1513_p5 = scmp.ne.s32.totalorder %s18_s15, %s1512_s19  ;;  %p1518_p7 = scmp.lt.s32.totalorder %s1512_s19, %s1512_s19 }
  0x10   :  { %p1519_p8 = por %p1518_p7, %p1517_p6 }
  0x12   :  { %p1520_p9 = pnand %p1519_p8, %p1513_p5 }
  0x14   :  { %1523 = shalt.err (!%p1520_p9)
}
  0x15   :  { %20 = dma.hbm_to_vmem [thread:$0]  %s2008_s0, 64, %s18_s15, [#allocation3]  }
  0x16   :  { %s1572_s22 = smov [#allocation7]  }
  0x17   :  { %s37_s23 = sshll.u32 %s1572_s22, 4  ;;  %s38_s23 = int_to_ptr.vmem [resolvable:$true] %s37_s23 }
  0x18   :  { %s1532_s24 = scalar_lea.vmem %s38_s23, 64  ;;  %p1537_p11 = scmp.lt.s32.totalorder %s38_s23, %s38_s23 }
  0x19   :  { %p1533_p10 = scmp.ne.s32.totalorder %s38_s23, %s1532_s24  ;;  %p1538_p12 = scmp.lt.s32.totalorder %s1532_s24, %s1532_s24 }
  0x1b   :  { %p1539_p13 = por %p1538_p12, %p1537_p11 }
  0x1d   :  { %p1540_p0 = pnand %p1539_p13, %p1533_p10 }
  0x1f   :  { %1543 = shalt.err (!%p1540_p0)
}
  0x20   :  { %40 = dma.hbm_to_vmem [thread:$0]  %s2010_s2, 64, %s38_s23, [#allocation6]  }
  0x21   :  { %1564 = dma.done.wait [#allocation3], 64  }
  0x22   :  { %1565 = vsyncadd [#allocation3], 4294967232 }
  0x23   :  { %1566 = dma.done.wait [#allocation6], 128  }
  0x24   :  { %1567 = vsyncadd [#allocation6], 4294967168  ;;  %v90_v0 = vld [vmem:[#allocation5] sm:$0xf]  ;;  %s1573_s0 = smov 80   ;;  %s1574_s26 = smov 112   ;;  %v177_v5 = vlaneseq }
  0x25   :  { %99 = vrot.lane.b32.xlu1 %v90_v0, %s1573_s0  ;;  %93 = vrot.lane.b32.xlu0 %v90_v0, %s1574_s26  ;;  %s1575_s27 = smov 64   ;;  %s1576_s28 = smov 96   ;;  %v1620_v1 = vld [vmem:[#allocation2] sm:$0xf]  ;;  %v1637_v2 = vld [vmem:[#allocation7] sm:$0xf] }
  0x26   :  { %s1577_s29 = smov 32   ;;  %s1578_s2 = smov 48   ;;  %v1580_v3 = vmov 1966171168   ;;  %v1650_v9 = vshrl.u32 %v177_v5, 7  ;;  %v92_v10 = vrot.slane %v90_v0, 1 }
  0x27   :  { %s1579_s30 = smov 16   ;;  %v175_v4 = vunpack.c.l.s4 %v1580_v3  ;;  %v114_v15 = vrot.slane %v90_v0, 2  ;;  %v122_v16 = vrot.slane %v90_v0, 3  ;;  %v52_v28 = vrot.slane %v1620_v1, 1  ;;  %s1584_s4 = smov [#allocation8]  }
  0x28   :  { %v74_v29 = vrot.slane %v1620_v1, 2  ;;  %v82_v30 = vrot.slane %v1620_v1, 3  ;;  %vm562_vm0 = vcmask 130048   ;;  %vm664_vm1 = vcmask 261120   ;;  %s1387_s5 = sshll.u32 %s1584_s4, 4  ;;  %s1388_s5 = int_to_ptr.vmem [resolvable:$true] %s1387_s5 }
  0x29   :  { %102 = vrot.lane.b32.xlu1 %v90_v0, %s1575_s27  ;;  %96 = vrot.lane.b32.xlu0 %v90_v0, %s1576_s28  ;;  %v176_v8 = vunpack.c.0.s8 %v175_v4  ;;  %vm1316_vm2 = vcmask 392192   ;;  %vm1318_vm3 = vcmask 523264   ;;  %vm1320_vm4 = vcmask 654336   ;;  %s1544_s6 = scalar_lea.vmem %s1388_s5, 64  ;;  %p1549_p2 = scmp.lt.s32.totalorder %s1388_s5, %s1388_s5 }
  0x2a   :  { %vm1322_vm5 = vcmask 785408   ;;  %vm1324_vm6 = vcmask 916480   ;;  %vm1378_vm7 = vcmp.lt.s32.totalorder %v177_v5, 512  ;;  %p1545_p1 = scmp.ne.s32.totalorder %s1388_s5, %s1544_s6  ;;  %p1550_p3 = scmp.lt.s32.totalorder %s1544_s6, %s1544_s6 }
  0x2b   :  { %v1655_v14 = vsub.s32 %v176_v8, %v1650_v9 }
  0x2c   :  { %p1551_p4 = por %p1550_p3, %p1549_p2 }
  0x2d   :  { %108 = vrot.lane.b32.xlu1 %v90_v0, %s1577_s29  ;;  %105 = vrot.lane.b32.xlu0 %v90_v0, %s1578_s2 }
  0x2e   :  { %p1552_p5 = pnand %p1551_p4, %p1545_p1 }
  0x31   :  { %111 = vrot.lane.b32.xlu0 %v90_v0, %s1579_s30  ;;  %53 = vrot.lane.b32.xlu1 %v1620_v1, %s1574_s26 }
  0x35   :  { %56 = vrot.lane.b32.xlu0 %v1620_v1, %s1576_s28  ;;  %59 = vrot.lane.b32.xlu1 %v1620_v1, %s1573_s0 }
  0x39   :  { %62 = vrot.lane.b32.xlu0 %v1620_v1, %s1575_s27  ;;  %65 = vrot.lane.b32.xlu1 %v1620_v1, %s1578_s2 }
  0x3d   :  { %68 = vrot.lane.b32.xlu0 %v1620_v1, %s1577_s29  ;;  %71 = vrot.lane.b32.xlu1 %v1620_v1, %s1579_s30 }
  0x41   :  { %133 = vrot.lane.b32.xlu1 %v1637_v2, %s1574_s26  ;;  %136 = vrot.lane.b32.xlu0 %v1637_v2, %s1576_s28 }
  0x45   :  { %139 = vrot.lane.b32.xlu1 %v1637_v2, %s1573_s0  ;;  %145 = vrot.lane.b32.xlu0 %v1637_v2, %s1578_s2 }
  0x49   :  { %142 = vrot.lane.b32.xlu1 %v1637_v2, %s1575_s27 }
  0x97   :  { %v100_v6 = vpop.permute.xlu1 %99  ;;  %v94_v7 = vpop.permute.xlu0 %93 }
  0x98   :  { %v95_v11 = vrot.slane %v94_v7, 1  ;;  %v115_v17 = vrot.slane %v94_v7, 2  ;;  %v123_v18 = vrot.slane %v94_v7, 3  ;;  %v366_v19 = vcombine.low %v90_v0, %v94_v7 }
  0x99   :  { %v101_v23 = vrot.slane %v100_v6, 1  ;;  %v117_v24 = vrot.slane %v100_v6, 2  ;;  %v125_v27 = vrot.slane %v100_v6, 3 }
  0x9a   :  { %v415_v20 = vcombine.low %v92_v10, %v95_v11  ;;  %v1663_v31 = vrot.slane %v366_v19, %v1655_v14  ;;  %v464_v33 = vcombine.low %v114_v15, %v115_v17  ;;  %v1666_v34 = vcombine.low %v122_v16, %v123_v18 }
  0x9b   :  { %v1652_v12 = vpop.permute.xlu1 %102  ;;  %v97_v13 = vpop.permute.xlu0 %96 }
  0x9c   :  { %v98_v25 = vrot.slane %v97_v13, 1  ;;  %v116_v26 = vrot.slane %v97_v13, 2  ;;  %v425_v32 = vrot.slane %v415_v20, %v1655_v14  ;;  %v124_v37 = vrot.slane %v97_v13, 3 }
  0x9d   :  { %v367_v38 = vcombine.low %v97_v13, %v100_v6  ;;  %v104_v41 = vrot.slane %v1652_v12, 1  ;;  %v118_v42 = vrot.slane %v1652_v12, 2  ;;  %v474_v49 = vrot.slane %v464_v33, %v1655_v14 }
  0x9e   :  { %v416_v39 = vcombine.low %v98_v25, %v101_v23  ;;  %v465_v40 = vcombine.low %v116_v26, %v117_v24  ;;  %v126_v50 = vrot.slane %v1652_v12, 3  ;;  %v523_v54 = vrot.slane %v1666_v34, %v1655_v14 }
  0x9f   :  { %v1657_v21 = vpop.permute.xlu1 %108  ;;  %v106_v22 = vpop.permute.xlu0 %105  ;;  %v1684_v55 = vrot.slane %v367_v38, %v1655_v14  ;;  %v514_v58 = vcombine.low %v124_v37, %v125_v27 }
  0xa0   :  { %v107_v43 = vrot.slane %v106_v22, 1  ;;  %v119_v44 = vrot.slane %v106_v22, 2  ;;  %v110_v45 = vrot.slane %v1657_v21, 1  ;;  %v120_v46 = vrot.slane %v1657_v21, 2 }
  0xa1   :  { %v432_v56 = vrot.slane %v416_v39, %v1655_v14  ;;  %v481_v57 = vrot.slane %v465_v40, %v1655_v14  ;;  %v127_v59 = vrot.slane %v106_v22, 3  ;;  %v368_v60 = vcombine.low %v1652_v12, %v106_v22 }
  0xa2   :  { %v417_v61 = vcombine.low %v104_v41, %v107_v43  ;;  %v466_v62 = vcombine.low %v118_v42, %v119_v44  ;;  %v128_v63 = vrot.slane %v1657_v21, 3  ;;  %v398_v12 = vcombine.low %v1663_v31, %v1684_v55 }
  0xa3   :  { %v112_v35 = vpop.permute.xlu0 %111  ;;  %v1668_v36 = vpop.permute.xlu1 %53  ;;  %v530_v15 = vrot.slane %v514_v58, %v1655_v14  ;;  %v496_v16 = vcombine.low %v474_v49, %v481_v57  ;;  %v1703_v17 = vcombine.low %v425_v32, %v432_v56  ;;  %v1706_v18 = vrot.slane %v368_v60, %v1655_v14 }
  0xa4   :  { %v113_v47 = vrot.slane %v112_v35, 1  ;;  %v121_v48 = vrot.slane %v112_v35, 2  ;;  %v369_v51 = vcombine.low %v1657_v21, %v112_v35  ;;  %v129_v0 = vrot.slane %v112_v35, 3 }
  0xa5   :  { %v55_v7 = vrot.slane %v1668_v36, 1  ;;  %v75_v8 = vrot.slane %v1668_v36, 2  ;;  %v83_v10 = vrot.slane %v1668_v36, 3  ;;  %v439_v19 = vrot.slane %v417_v61, %v1655_v14 }
  0xa6   :  { %v418_v3 = vcombine.low %v110_v45, %v113_v47  ;;  %v467_v4 = vcombine.low %v120_v46, %v121_v48  ;;  %v1691_v6 = vrot.slane %v369_v51, %v1655_v14  ;;  %v488_v20 = vrot.slane %v466_v62, %v1655_v14 }
  0xa7   :  { %v1677_v52 = vpop.permute.xlu0 %56  ;;  %v1679_v53 = vpop.permute.xlu1 %59  ;;  %v515_v21 = vcombine.low %v126_v50, %v127_v59  ;;  %v516_v24 = vcombine.low %v128_v63, %v129_v0  ;;  %v170_v25 = vcombine.low %v1620_v1, %v1668_v36  ;;  %v1716_v27 = vcombine.low %v52_v28, %v55_v7 }
  0xa8   :  { %v446_v22 = vrot.slane %v418_v3, %v1655_v14  ;;  %v495_v23 = vrot.slane %v467_v4, %v1655_v14  ;;  %v399_v26 = vcombine.low %v1706_v18, %v1691_v6  ;;  %v1718_v32 = vcombine.low %v74_v29, %v75_v8 }
  0xa9   :  { %v1720_v33 = vcombine.low %v82_v30, %v83_v10  ;;  %v58_v34 = vrot.slane %v1677_v52, 1  ;;  %v76_v35 = vrot.slane %v1677_v52, 2  ;;  %v84_v37 = vrot.slane %v1677_v52, 3 }
  0xaa   :  { %v61_v38 = vrot.slane %v1679_v53, 1  ;;  %v77_v36 = vrot.slane %v1679_v53, 2  ;;  %v171_v28 = vcombine.low %v1677_v52, %v1679_v53  ;;  %v537_v42 = vrot.slane %v515_v21, %v1655_v14 }
  0xab   :  { %v1696_v11 = vpop.permute.xlu0 %62  ;;  %v1698_v13 = vpop.permute.xlu1 %65  ;;  %v544_v43 = vrot.slane %v516_v24, %v1655_v14  ;;  %v545_v46 = vcombine.low %v523_v54, %v530_v15  ;;  %v497_v47 = vcombine.low %v488_v20, %v495_v23  ;;  %v448_v54 = vcombine.low %v439_v19, %v446_v22 }
  0xac   :  { %v64_v29 = vrot.slane %v1696_v11, 1  ;;  %v67_v30 = vrot.slane %v1698_v13, 1  ;;  %v78_v40 = vrot.slane %v1696_v11, 2  ;;  %v86_v41 = vrot.slane %v1696_v11, 3 }
  0xad   :  { %v79_v48 = vrot.slane %v1698_v13, 2  ;;  %v87_v49 = vrot.slane %v1698_v13, 3  ;;  %v172_v50 = vcombine.low %v1696_v11, %v1698_v13  ;;  %v546_v51 = vcombine.low %v537_v42, %v544_v43 }
  0xae   :  { %v221_v52 = vcombine.low %v64_v29, %v67_v30  ;;  %v553_v59 = vrot.slane %v545_v46, %v1655_v14  ;;  %v511_v61 = vrot.slane %v497_v47, %v1655_v14  ;;  %v180_v3 = vrot.slane %v170_v25, %v1655_v14 }
  0xaf   :  { %v69_v39 = vpop.permute.xlu0 %68  ;;  %v72_v1 = vpop.permute.xlu1 %71  ;;  %v560_v60 = vrot.slane %v546_v51, %v1655_v14  ;;  %v504_v7 = vrot.slane %v496_v16, %v1655_v14  ;;  %v187_v8 = vrot.slane %v171_v28, %v1655_v14  ;;  %v194_v10 = vrot.slane %v172_v50, %v1655_v14 }
  0xb0   :  { %v70_v44 = vrot.slane %v69_v39, 1  ;;  %v73_v45 = vrot.slane %v72_v1, 1  ;;  %v80_v56 = vrot.slane %v69_v39, 2  ;;  %v81_v57 = vrot.slane %v72_v1, 2 }
  0xb1   :  { %v173_v58 = vcombine.low %v69_v39, %v72_v1  ;;  %v88_v62 = vrot.slane %v69_v39, 3  ;;  %v89_v63 = vrot.slane %v72_v1, 3  ;;  %v561_v4 = vcombine.low %v553_v59, %v560_v60 }
  0xb2   :  { %v222_v0 = vcombine.low %v70_v44, %v73_v45  ;;  %v85_v11 = vrot.slane %v1679_v53, 3  ;;  %v270_v13 = vcombine.low %v78_v40, %v79_v48  ;;  %v271_v15 = vcombine.low %v80_v56, %v81_v57 }
  0xb3   :  { %v201_v20 = vrot.slane %v173_v58, %v1655_v14  ;;  %v220_v21 = vcombine.low %v58_v34, %v61_v38  ;;  %1425 = vmatprep.subr.msk.mxu0 %vm562_vm0, %v561_v4  ;;  %v512_v19 = vcombine.low %v504_v7, %v511_v61  ;;  %v462_v22 = vrot.slane %v448_v54, %v1655_v14 }
  0xb4   :  { %v202_v23 = vcombine.low %v180_v3, %v187_v8  ;;  %v229_v16 = vrot.slane %v1716_v27, %v1655_v14  ;;  %v269_v24 = vcombine.low %v76_v35, %v77_v36  ;;  %v319_v25 = vcombine.low %v86_v41, %v87_v49  ;;  %1426 = vmatpush3.xpose.msk.msra.mxu0 %vm562_vm0, %v561_v4  ;;  %v1802_v4 = vpop.permute.xlu1 %133  ;;  %v1806_v8 = vpop.permute.xlu0 %136 }
  0xb5   :  { %v203_v39 = vcombine.low %v194_v10, %v201_v20  ;;  %v243_v53 = vrot.slane %v221_v52, %v1655_v14  ;;  %v250_v1 = vrot.slane %v222_v0, %v1655_v14  ;;  %v320_v28 = vcombine.low %v88_v62, %v89_v63  ;;  %1427 = vmatprep.subr.msk.mxu0 %vm562_vm0, %v512_v19 }
  0xb6   :  { %v455_v34 = vrot.slane %v1703_v17, %v1655_v14  ;;  %v292_v38 = vrot.slane %v270_v13, %v1655_v14  ;;  %v299_v29 = vrot.slane %v271_v15, %v1655_v14  ;;  %v210_v27 = vrot.slane %v202_v23, %v1655_v14 }
  0xb7   :  { %v217_v35 = vrot.slane %v203_v39, %v1655_v14  ;;  %v236_v36 = vrot.slane %v220_v21, %v1655_v14  ;;  %v318_v30 = vcombine.low %v84_v37, %v85_v11  ;;  %v413_v41 = vrot.slane %v399_v26, %v1655_v14 }
  0xb8   :  { %v463_v40 = vcombine.low %v455_v34, %v462_v22  ;;  %v278_v17 = vrot.slane %v1718_v32, %v1655_v14  ;;  %v285_v42 = vrot.slane %v269_v24, %v1655_v14  ;;  %1428 = vmatpush3.xpose.msk.msra.mxu0 %vm562_vm0, %v512_v19  ;;  %v341_v44 = vrot.slane %v319_v25, %v1655_v14  ;;  %v1804_v7 = vpop.permute.xlu1 %139  ;;  %v1810_v11 = vpop.permute.xlu0 %145 }
  0xb9   :  { %v218_v43 = vcombine.low %v210_v27, %v217_v35  ;;  %v348_v45 = vrot.slane %v320_v28, %v1655_v14  ;;  %v406_v6 = vrot.slane %v398_v12, %v1655_v14  ;;  %v252_v18 = vcombine.low %v243_v53, %v250_v1 }
  0xba   :  { %1429 = vmatprep.subr.msk.mxu0 %vm562_vm0, %v463_v40  ;;  %v301_v26 = vcombine.low %v292_v38, %v299_v29  ;;  %v327_v32 = vrot.slane %v1720_v33, %v1655_v14  ;;  %v334_v37 = vrot.slane %v318_v30, %v1655_v14  ;;  %v251_v47 = vcombine.low %v229_v16, %v236_v36 }
  0xbb   :  { %1433 = vmatprep.mubr.msk.f32.mxu0 %vm562_vm0, %v218_v43  ;;  %v414_v46 = vcombine.low %v406_v6, %v413_v41  ;;  %v300_v48 = vcombine.low %v278_v17, %v285_v42  ;;  %v266_v49 = vrot.slane %v252_v18, %v1655_v14  ;;  %v350_v31 = vcombine.low %v341_v44, %v348_v45 }
  0xbc   :  { %1430 = vmatpush3.xpose.msk.msra.mxu0 %vm562_vm0, %v463_v40  ;;  %v315_v55 = vrot.slane %v301_v26, %v1655_v14  ;;  %v259_v12 = vrot.slane %v251_v47, %v1655_v14  ;;  %v349_v50 = vcombine.low %v327_v32, %v334_v37  ;;  %v1808_v10 = vpop.permute.xlu1 %142  ;;  %v132_v20 = vrot.slane %v1637_v2, 1 }
  0xbd   :  { %1431 = vmatprep.subr.msk.mxu0 %vm562_vm0, %v414_v46  ;;  %v308_v33 = vrot.slane %v300_v48, %v1655_v14  ;;  %v364_v52 = vrot.slane %v350_v31, %v1655_v14  ;;  %v154_v21 = vrot.slane %v1637_v2, 2  ;;  %v135_v22 = vrot.slane %v1802_v4, 1 }
  0xbe   :  { %v267_v51 = vcombine.low %v259_v12, %v266_v49  ;;  %v357_v57 = vrot.slane %v349_v50, %v1655_v14  ;;  %v155_v23 = vrot.slane %v1802_v4, 2  ;;  %v162_v25 = vrot.slane %v1637_v2, 3 }
  0xbf   :  { %v316_v56 = vcombine.low %v308_v33, %v315_v55  ;;  %v163_v39 = vrot.slane %v1802_v4, 3  ;;  %v138_v1 = vrot.slane %v1806_v8, 1  ;;  %v156_v28 = vrot.slane %v1806_v8, 2 }
  0xc0   :  { %1432 = vmatpush3.xpose.msk.msra.mxu0 %vm562_vm0, %v414_v46  ;;  %v365_v58 = vcombine.low %v357_v57, %v364_v52  ;;  %v164_v34 = vrot.slane %v1806_v8, 3  ;;  %v165_v38 = vrot.slane %v1804_v7, 3  ;;  %v1822_v27 = vcombine.low %v132_v20, %v135_v22 }
  0xc1   :  { %v799_v35 = vcombine.low %v154_v21, %v155_v23  ;;  %v141_v30 = vrot.slane %v1804_v7, 1  ;;  %v157_v40 = vrot.slane %v1804_v7, 2  ;;  %v147_v41 = vrot.slane %v1810_v11, 1 }
  0xc2   :  { %v144_v17 = vrot.slane %v1808_v10, 1  ;;  %v701_v42 = vcombine.low %v1637_v2, %v1802_v4  ;;  %v848_v43 = vcombine.low %v162_v25, %v163_v39  ;;  %v159_v44 = vrot.slane %v1810_v11, 2 }
  0xc3   :  { %1434 = vmatmul.mubr.msk.f32.vlgmr.msra.gmra.mxu0 %vm562_vm0, %v267_v51  ;;  %v849_v6 = vcombine.low %v164_v34, %v165_v38  ;;  %v167_v18 = vrot.slane %v1810_v11, 3  ;;  %v158_v26 = vrot.slane %v1808_v10, 2  ;;  %v166_v32 = vrot.slane %v1808_v10, 3 }
  0xc4   :  { %1436 = vmatprep.mubr.msk.f32.mxu0 %vm562_vm0, %v316_v56  ;;  %v760_v47 = vrot.slane %v1822_v27, %v1655_v14  ;;  %v809_v48 = vrot.slane %v799_v35, %v1655_v14  ;;  %v702_v49 = vcombine.low %v1806_v8, %v1804_v7  ;;  %v751_v31 = vcombine.low %v138_v1, %v141_v30 }
  0xc5   :  { %v800_v55 = vcombine.low %v156_v28, %v157_v40  ;;  %v752_v12 = vcombine.low %v144_v17, %v147_v41  ;;  %v801_v56 = vcombine.low %v158_v26, %v159_v44  ;;  %v850_v57 = vcombine.low %v166_v32, %v167_v18 }
  0xc6   :  { %v711_v39 = vrot.slane %v701_v42, %v1655_v14 }
  0xc7   :  { %1437 = vmatmul.mubr.msk.f32.gmra.mxu0 %vm562_vm0, %v365_v58  ;;  %v774_v7 = vrot.slane %v752_v12, %v1655_v14  ;;  %v823_v21 = vrot.slane %v801_v56, %v1655_v14  ;;  %v872_v22 = vrot.slane %v850_v57, %v1655_v14 }
 0x183   :  { %v1435_v59 = vpop.f32.mrf.mxu0 }
 0x184   :  { %v668_v60 = vsel %vm664_vm1, %v1435_v59, -inf }
 0x185   :  { %669 = vmax.xlane.f32.xlu1 %v668_v60  ;;  %v645_v61 = vpop.f32.mrf.mxu0  ;;  %v865_v60 = vrot.slane %v849_v6, %v1655_v14 }
 0x186   :  { %v665_v54 = vsel %vm664_vm1, %v645_v61, -inf }
 0x187   :  { %666 = vmax.xlane.f32.xlu0 %v665_v54  ;;  %v1438_v62 = vpop.f32.mrf.mxu0 }
 0x188   :  { %v674_v63 = vsel %vm664_vm1, %v1438_v62, -inf }
 0x189   :  { %v655_v0 = vpop.f32.mrf.mxu0 }
 0x18a   :  { %v671_v3 = vsel %vm664_vm1, %v655_v0, -inf }
 0x18b   :  { %675 = vmax.xlane.f32.xlu0 %v674_v63  ;;  %v767_v63 = vrot.slane %v751_v31, %v1655_v14 }
 0x18d   :  { %v782_v35 = vcombine.low %v760_v47, %v767_v63 }
 0x18f   :  { %672 = vmax.xlane.f32.xlu0 %v671_v3  ;;  %v703_v3 = vcombine.low %v1808_v10, %v1810_v11  ;;  %v790_v26 = vrot.slane %v782_v35, %v1655_v14 }
 0x191   :  { %v725_v1 = vrot.slane %v703_v3, %v1655_v14 }
 0x196   :  { %148 = vrot.lane.b32.xlu1 %v1637_v2, %s1577_s29 }
 0x1a5   :  { %151 = vrot.lane.b32.xlu0 %v1637_v2, %s1579_s30 }
 0x20e   :  { %v670_v13 = vpop.xlane.xlu1 %669 }
 0x20f   :  { %v678_v15 = vsub.f32 %v1435_v59, %v670_v13  ;;  %v858_v59 = vrot.slane %v848_v43, %v1655_v14 }
 0x210   :  { %v667_v19 = vpop.xlane.xlu0 %666 }
 0x211   :  { %v683_v16 = vmul.f32 1.442695, %v678_v15  ;;  %v677_v24 = vsub.f32 %v645_v61, %v667_v19  ;;  %v880_v23 = vcombine.low %v858_v59, %v865_v60 }
 0x212   :  { %v149_v46 = vpop.permute.xlu1 %148 }
 0x213   :  { %1468 = vpow2.f32 %v683_v16  ;;  %v681_v53 = vmul.f32 1.442695, %v677_v24  ;;  %v150_v33 = vrot.slane %v149_v46, 1  ;;  %v160_v51 = vrot.slane %v149_v46, 2 }
 0x214   :  { %v676_v29 = vpop.xlane.xlu0 %675  ;;  %v168_v52 = vrot.slane %v149_v46, 3 }
 0x215   :  { %1470 = vpow2.f32 %v681_v53  ;;  %v680_v36 = vsub.f32 %v1438_v62, %v676_v29  ;;  %v718_v53 = vrot.slane %v702_v49, %v1655_v14 }
 0x217   :  { %v687_v45 = vmul.f32 1.442695, %v680_v36  ;;  %v888_v36 = vrot.slane %v880_v23, %v1655_v14  ;;  %v733_v42 = vcombine.low %v711_v39, %v718_v53 }
 0x218   :  { %v673_v37 = vpop.xlane.xlu0 %672 }
 0x219   :  { %1472 = vpow2.f32 %v687_v45  ;;  %v679_v2 = vsub.f32 %v655_v0, %v673_v37  ;;  %v816_v0 = vrot.slane %v800_v55, %v1655_v14  ;;  %v1581_v55 = vmov 1983009808  }
 0x21a   :  { %v1008_v12 = vunpack.c.l.s4 %v1581_v55 }
 0x21b   :  { %v685_v50 = vmul.f32 1.442695, %v679_v2  ;;  %v831_v28 = vcombine.low %v809_v48, %v816_v0  ;;  %v741_v48 = vrot.slane %v733_v42, %v1655_v14  ;;  %v1583_v0 = vmov 0.0  }
 0x21c   :  { %v152_v58 = vpop.permute.xlu0 %151 }
 0x21d   :  { %1474 = vpow2.f32 %v685_v50  ;;  %v153_v61 = vrot.slane %v152_v58, 1  ;;  %v161_v54 = vrot.slane %v152_v58, 2  ;;  %v169_v62 = vrot.slane %v152_v58, 3 }
 0x21e   :  { %v704_v4 = vcombine.low %v149_v46, %v152_v58  ;;  %v839_v45 = vrot.slane %v831_v28, %v1655_v14  ;;  %v1582_v50 = vmov 1934713408  }
 0x21f   :  { %v753_v8 = vcombine.low %v150_v33, %v153_v61  ;;  %v802_v13 = vcombine.low %v160_v51, %v161_v54  ;;  %v851_v15 = vcombine.low %v168_v52, %v169_v62  ;;  %v1023_v33 = vunpack.c.l.s4 %v1582_v50 }
 0x220   :  { %v1469_v20 = vpop.eup %1468  ;;  %v732_v19 = vrot.slane %v704_v4, %v1655_v14  ;;  %v1009_v51 = vunpack.c.0.s8 %v1008_v12 }
 0x221   :  { %v781_v16 = vrot.slane %v753_v8, %v1655_v14  ;;  %v830_v24 = vrot.slane %v802_v13, %v1655_v14  ;;  %v692_v10 = vsel %vm664_vm1, %v1469_v20, 0.0  ;;  %v879_v11 = vrot.slane %v851_v15, %v1655_v14 }
 0x222   :  { %v1471_v25 = vpop.eup %1470  ;;  %693 = vadd.xlane.f32.xlu0 %v692_v10  ;;  %v734_v41 = vcombine.low %v725_v1, %v732_v19  ;;  %v1024_v52 = vunpack.c.0.s8 %v1023_v33  ;;  %v1872_v56 = vsub.s32 %v1009_v51, %v1650_v9 }
 0x223   :  { %1447 = vmatprep.mubr.msk.f32.mxu1 %vm664_vm1, %v1471_v25  ;;  %v689_v34 = vsel %vm664_vm1, %v1471_v25, 0.0  ;;  %v881_v38 = vcombine.low %v872_v22, %v879_v11  ;;  %v832_v29 = vcombine.low %v823_v21, %v830_v24  ;;  %v783_v27 = vcombine.low %v774_v7, %v781_v16 }
 0x224   :  { %690 = vadd.xlane.f32.xlu1 %v689_v34  ;;  %v748_v32 = vrot.slane %v734_v41, %v1655_v14  ;;  %v1875_v54 = vsub.s32 %v1024_v52, %v1650_v9 }
 0x225   :  { %v895_v30 = vrot.slane %v881_v38, %v1655_v14  ;;  %v846_v40 = vrot.slane %v832_v29, %v1655_v14  ;;  %v797_v6 = vrot.slane %v783_v27, %v1655_v14 }
 0x226   :  { %v1473_v17 = vpop.eup %1472  ;;  %v749_v2 = vcombine.low %v741_v48, %v748_v32 }
 0x227   :  { %v698_v43 = vsel %vm664_vm1, %v1473_v17, 0.0  ;;  %v896_v44 = vcombine.low %v888_v36, %v895_v30  ;;  %v847_v18 = vcombine.low %v839_v45, %v846_v40  ;;  %v798_v47 = vcombine.low %v790_v26, %v797_v6 }
 0x228   :  { %699 = vadd.xlane.f32.xlu1 %v698_v43 }
 0x229   :  { %1439 = vmatprep.subr.mxu1 %v896_v44 }
 0x22a   :  { %v1475_v37 = vpop.eup %1474  ;;  %1440 = vmatpush3.msra.mxu1 %v896_v44 }
 0x22b   :  { %1441 = vmatprep.subr.mxu1 %v847_v18  ;;  %v695_v46 = vsel %vm664_vm1, %v1475_v37, 0.0 }
 0x22c   :  { %696 = vadd.xlane.f32.xlu0 %v695_v46  ;;  %1442 = vmatpush3.msra.mxu1 %v847_v18 }
 0x22d   :  { %1443 = vmatprep.subr.mxu1 %v798_v47 }
 0x22e   :  { %1444 = vmatpush3.msra.mxu1 %v798_v47 }
 0x22f   :  { %1445 = vmatprep.subr.mxu1 %v749_v2 }
 0x230   :  { %1446 = vmatpush3.msra.mxu1 %v749_v2 }
 0x231   :  { %1448 = vmatmul.mubr.msk.f32.vlgmr.msra.gmra.mxu1 %vm664_vm1, %v1469_v20 }
 0x232   :  { %1450 = vmatprep.mubr.msk.f32.mxu1 %vm664_vm1, %v1475_v37 }
 0x235   :  { %1451 = vmatmul.mubr.msk.f32.gmra.mxu1 %vm664_vm1, %v1473_v17 }
 0x2ab   :  { %v694_v49 = vpop.xlane.xlu0 %693 }
 0x2ac   :  { %1476 = vrcp.f32 %v694_v49 }
 0x2ad   :  { %v691_v31 = vpop.xlane.xlu1 %690 }
 0x2ae   :  { %1478 = vrcp.f32 %v691_v31 }
 0x2b1   :  { %v700_v58 = vpop.xlane.xlu1 %699 }
 0x2b2   :  { %1480 = vrcp.f32 %v700_v58 }
 0x2b5   :  { %v697_v60 = vpop.xlane.xlu0 %696 }
 0x2b6   :  { %1482 = vrcp.f32 %v697_v60 }
 0x2b9   :  { %v1477_v57 = vpop.eup %1476 }
 0x2bb   :  { %v1479_v62 = vpop.eup %1478 }
 0x2bf   :  { %v1481_v1 = vpop.eup %1480 }
 0x2c3   :  { %v1483_v28 = vpop.eup %1482 }
 0x2f1   :  { %v1449_v59 = vpop.f32.mrf.mxu1 }
 0x2f2   :  { %v1001_v61 = vmul.f32 %v1477_v57, %v1449_v59 }
 0x2f3   :  { %v979_v63 = vpop.f32.mrf.mxu1 }
 0x2f4   :  { %v1055_v3 = vcombine.high %v1001_v61, %v1583_v0  ;;  %v1062_v4 = vrot.slane %v1001_v61, %v1872_v56  ;;  %v999_v7 = vmul.f32 %v1479_v62, %v979_v63 }
 0x2f5   :  { %v1452_v24 = vpop.f32.mrf.mxu1 }
 0x2f6   :  { %v1070_v8 = vcombine.high %v1062_v4, %v1583_v0  ;;  %v1881_v13 = vrot.slane %v1062_v4, %v1875_v54  ;;  %v1013_v15 = vrot.slane %v999_v7, %v1872_v56  ;;  %v1069_v9 = vrot.slane %v1055_v3, %v1872_v56 }
 0x2f7   :  { %v1006_v20 = vcombine.high %v999_v7, %v1583_v0  ;;  %v989_v25 = vpop.f32.mrf.mxu1  ;;  %v1005_v34 = vmul.f32 %v1481_v1, %v1452_v24 }
 0x2f8   :  { %v1100_v21 = vcombine.high %v1881_v13, %v1583_v0  ;;  %v1084_v19 = vrot.slane %v1070_v8, %v1875_v54  ;;  %v1021_v22 = vcombine.high %v1013_v15, %v1583_v0  ;;  %v1894_v16 = vrot.slane %v1013_v15, %v1875_v54 }
 0x2f9   :  { %v1020_v23 = vrot.slane %v1006_v20, %v1872_v56  ;;  %v1092_v11 = vrot.slane %v1069_v9, %v1875_v54  ;;  %v1003_v38 = vmul.f32 %v1483_v28, %v989_v25  ;;  %v1160_v35 = vrot.slane %v1005_v34, %v1872_v56 }
 0x2fa   :  { %1231 = vrot.lane.b32.xlu1 %v1100_v21, %s1579_s30  ;;  %1235 = vrot.lane.b32.xlu0 %v1084_v19, %s1577_s29  ;;  %v1035_v10 = vrot.slane %v1021_v22, %v1875_v54  ;;  %v1051_v53 = vcombine.high %v1894_v16, %v1583_v0  ;;  %v1101_v27 = vcombine.high %v1084_v19, %v1583_v0 }
 0x2fb   :  { %v1043_v39 = vrot.slane %v1020_v23, %v1875_v54  ;;  %v1111_v36 = vrot.slane %v1003_v38, %v1872_v56  ;;  %v1102_v40 = vcombine.high %v1092_v11, %v1583_v0  ;;  %v1036_v41 = vcombine.high %v1020_v23, %v1583_v0 }
 0x2fc   :  { %v1052_v29 = vcombine.high %v1035_v10, %v1583_v0  ;;  %v1085_v17 = vcombine.high %v1069_v9, %v1583_v0  ;;  %v1918_v42 = vrot.slane %v1160_v35, %v1875_v54  ;;  %v1153_v6 = vcombine.high %v1005_v34, %v1583_v0 }
 0x2fd   :  { %v1053_v30 = vcombine.high %v1043_v39, %v1583_v0  ;;  %v1921_v43 = vrot.slane %v1111_v36, %v1875_v54  ;;  %v1050_v44 = vrot.slane %v1036_v41, %v1875_v54  ;;  %v1104_v18 = vcombine.high %v1003_v38, %v1583_v0 }
 0x2fe   :  { %1207 = vrot.lane.b32.xlu1 %v1035_v10, %s1577_s29  ;;  %1243 = vrot.lane.b32.xlu0 %v1092_v11, %s1575_s27  ;;  %v1099_v45 = vrot.slane %v1085_v17, %v1875_v54  ;;  %v1168_v26 = vcombine.high %v1160_v35, %v1583_v0  ;;  %v1119_v32 = vcombine.high %v1111_v36, %v1583_v0 }
 0x2ff   :  { %v1198_v37 = vcombine.high %v1918_v42, %v1583_v0  ;;  %v1149_v46 = vcombine.high %v1921_v43, %v1583_v0  ;;  %v1167_v47 = vrot.slane %v1153_v6, %v1872_v56  ;;  %v1118_v48 = vrot.slane %v1104_v18, %v1872_v56 }
 0x300   :  { %v1182_v2 = vrot.slane %v1168_v26, %v1875_v54  ;;  %v1133_v49 = vrot.slane %v1119_v32, %v1875_v54  ;;  %v1103_v12 = vcombine.high %v1099_v45, %v1583_v0  ;;  %v1054_v50 = vcombine.high %v1050_v44, %v1583_v0 }
 0x301   :  { %v1190_v31 = vrot.slane %v1167_v47, %v1875_v54  ;;  %v1141_v55 = vrot.slane %v1118_v48, %v1875_v54  ;;  %v1183_v57 = vcombine.high %v1167_v47, %v1583_v0  ;;  %v1134_v58 = vcombine.high %v1118_v48, %v1583_v0 }
 0x302   :  { %1215 = vrot.lane.b32.xlu1 %v1043_v39, %s1575_s27  ;;  %1203 = vrot.lane.b32.xlu0 %v1051_v53, %s1579_s30  ;;  %v1199_v33 = vcombine.high %v1182_v2, %v1583_v0  ;;  %v1150_v51 = vcombine.high %v1133_v49, %v1583_v0 }
 0x303   :  { %v1200_v52 = vcombine.high %v1190_v31, %v1583_v0  ;;  %v1151_v56 = vcombine.high %v1141_v55, %v1583_v0  ;;  %v1197_v59 = vrot.slane %v1183_v57, %v1875_v54  ;;  %v1148_v60 = vrot.slane %v1134_v58, %v1875_v54 }
 0x305   :  { %v1201_v61 = vcombine.high %v1197_v59, %v1583_v0  ;;  %v1152_v62 = vcombine.high %v1148_v60, %v1583_v0 }
 0x306   :  { %1211 = vrot.lane.b32.xlu1 %v1052_v29, %s1578_s2  ;;  %1239 = vrot.lane.b32.xlu0 %v1101_v27, %s1578_s2 }
 0x30a   :  { %1219 = vrot.lane.b32.xlu1 %v1053_v30, %s1573_s0  ;;  %1247 = vrot.lane.b32.xlu0 %v1102_v40, %s1573_s0 }
 0x30e   :  { %1223 = vrot.lane.b32.xlu1 %v1050_v44, %s1576_s28  ;;  %1251 = vrot.lane.b32.xlu0 %v1099_v45, %s1576_s28 }
 0x312   :  { %1287 = vrot.lane.b32.xlu0 %v1198_v37, %s1579_s30  ;;  %1259 = vrot.lane.b32.xlu1 %v1149_v46, %s1579_s30 }
 0x316   :  { %1291 = vrot.lane.b32.xlu0 %v1182_v2, %s1577_s29  ;;  %1263 = vrot.lane.b32.xlu1 %v1133_v49, %s1577_s29 }
 0x31a   :  { %1299 = vrot.lane.b32.xlu0 %v1190_v31, %s1575_s27  ;;  %1271 = vrot.lane.b32.xlu1 %v1141_v55, %s1575_s27 }
 0x31e   :  { %1255 = vrot.lane.b32.xlu0 %v1103_v12, %s1574_s26  ;;  %1227 = vrot.lane.b32.xlu1 %v1054_v50, %s1574_s26 }
 0x322   :  { %1295 = vrot.lane.b32.xlu0 %v1199_v33, %s1578_s2  ;;  %1267 = vrot.lane.b32.xlu1 %v1150_v51, %s1578_s2 }
 0x326   :  { %1303 = vrot.lane.b32.xlu0 %v1200_v52, %s1573_s0  ;;  %1275 = vrot.lane.b32.xlu1 %v1151_v56, %s1573_s0 }
 0x32a   :  { %1307 = vrot.lane.b32.xlu0 %v1197_v59, %s1576_s28  ;;  %1279 = vrot.lane.b32.xlu1 %v1148_v60, %s1576_s28 }
 0x32e   :  { %1311 = vrot.lane.b32.xlu0 %v1201_v61, %s1574_s26  ;;  %1283 = vrot.lane.b32.xlu1 %v1152_v62, %s1574_s26 }
 0x36c   :  { %v1232_v63 = vpop.permute.xlu1 %1231  ;;  %v1236_v3 = vpop.permute.xlu0 %1235 }
 0x36d   :  { %v1326_v1 = vsel %vm562_vm0, %v1881_v13, %v1232_v63 }
 0x36e   :  { %v1327_v29 = vsel %vm664_vm1, %v1326_v1, %v1236_v3 }
 0x370   :  { %v1208_v4 = vpop.permute.xlu1 %1207  ;;  %v1244_v7 = vpop.permute.xlu0 %1243 }
 0x374   :  { %v1216_v8 = vpop.permute.xlu1 %1215  ;;  %v1204_v15 = vpop.permute.xlu0 %1203 }
 0x375   :  { %v1314_v28 = vsel %vm562_vm0, %v1894_v16, %v1204_v15 }
 0x376   :  { %v1315_v27 = vsel %vm664_vm1, %v1314_v28, %v1208_v4 }
 0x378   :  { %v1212_v9 = vpop.permute.xlu1 %1211  ;;  %v1240_v54 = vpop.permute.xlu0 %1239 }
 0x379   :  { %v1317_v35 = vsel %vm1316_vm2, %v1315_v27, %v1212_v9  ;;  %v1328_v36 = vsel %vm1316_vm2, %v1327_v29, %v1240_v54 }
 0x37a   :  { %v1319_v41 = vsel %vm1318_vm3, %v1317_v35, %v1216_v8  ;;  %v1329_v17 = vsel %vm1318_vm3, %v1328_v36, %v1244_v7 }
 0x37c   :  { %v1220_v20 = vpop.permute.xlu1 %1219  ;;  %v1248_v21 = vpop.permute.xlu0 %1247 }
 0x37d   :  { %v1321_v6 = vsel %vm1320_vm4, %v1319_v41, %v1220_v20  ;;  %v1330_v18 = vsel %vm1320_vm4, %v1329_v17, %v1248_v21 }
 0x380   :  { %v1224_v19 = vpop.permute.xlu1 %1223  ;;  %v1252_v22 = vpop.permute.xlu0 %1251 }
 0x381   :  { %v1323_v32 = vsel %vm1322_vm5, %v1321_v6, %v1224_v19 }
 0x384   :  { %v1260_v23 = vpop.permute.xlu1 %1259  ;;  %v1288_v24 = vpop.permute.xlu0 %1287 }
 0x385   :  { %v1333_v13 = vsel %vm562_vm0, %v1921_v43, %v1260_v23  ;;  %v1340_v16 = vsel %vm562_vm0, %v1918_v42, %v1288_v24  ;;  %v1331_v42 = vsel %vm1322_vm5, %v1330_v18, %v1252_v22 }
 0x388   :  { %v1264_v10 = vpop.permute.xlu1 %1263  ;;  %v1292_v0 = vpop.permute.xlu0 %1291 }
 0x389   :  { %v1334_v44 = vsel %vm664_vm1, %v1333_v13, %v1264_v10  ;;  %v1341_v45 = vsel %vm664_vm1, %v1340_v16, %v1292_v0 }
 0x38c   :  { %v1272_v11 = vpop.permute.xlu1 %1271  ;;  %v1300_v25 = vpop.permute.xlu0 %1299 }
 0x390   :  { %v1228_v39 = vpop.permute.xlu1 %1227  ;;  %v1256_v53 = vpop.permute.xlu0 %1255 }
 0x391   :  { %v1325_v47 = vsel %vm1324_vm6, %v1323_v32, %v1228_v39  ;;  %v1332_v48 = vsel %vm1324_vm6, %v1331_v42, %v1256_v53 }
 0x392   :  { %v1351_v12 = vcombine.low %v1325_v47, %v1332_v48 }
 0x394   :  { %v1268_v34 = vpop.permute.xlu1 %1267  ;;  %v1296_v38 = vpop.permute.xlu0 %1295  ;;  %v1359_v59 = vrot.slane %v1351_v12, %v1655_v14 }
 0x395   :  { %v1335_v26 = vsel %vm1316_vm2, %v1334_v44, %v1268_v34  ;;  %v1342_v43 = vsel %vm1316_vm2, %v1341_v45, %v1296_v38 }
 0x396   :  { %v1336_v2 = vsel %vm1318_vm3, %v1335_v26, %v1272_v11  ;;  %v1343_v49 = vsel %vm1318_vm3, %v1342_v43, %v1300_v25 }
 0x398   :  { %v1276_v30 = vpop.permute.xlu1 %1275  ;;  %v1304_v40 = vpop.permute.xlu0 %1303 }
 0x399   :  { %v1337_v31 = vsel %vm1320_vm4, %v1336_v2, %v1276_v30  ;;  %v1344_v55 = vsel %vm1320_vm4, %v1343_v49, %v1304_v40 }
 0x39c   :  { %v1280_v37 = vpop.permute.xlu1 %1279  ;;  %v1308_v46 = vpop.permute.xlu0 %1307 }
 0x39d   :  { %v1338_v50 = vsel %vm1322_vm5, %v1337_v31, %v1280_v37  ;;  %v1345_v33 = vsel %vm1322_vm5, %v1344_v55, %v1308_v46 }
 0x3a0   :  { %v1284_v51 = vpop.permute.xlu1 %1283  ;;  %v1312_v52 = vpop.permute.xlu0 %1311 }
 0x3a1   :  { %v1339_v56 = vsel %vm1324_vm6, %v1338_v50, %v1284_v51  ;;  %v1346_v57 = vsel %vm1324_vm6, %v1345_v33, %v1312_v52 }
 0x3a2   :  { %v1352_v58 = vcombine.low %v1339_v56, %v1346_v57 }
 0x3a4   :  { %v1366_v60 = vrot.slane %v1352_v58, %v1655_v14 }
 0x3a6   :  { %v1367_v61 = vcombine.low %v1359_v59, %v1366_v60 }
 0x3a8   :  { %v1374_v62 = vrot.slane %v1367_v61, %v1655_v14 }
 0x3aa   :  { %1380 = vst.msk [vmem:[#allocation8] sm:$0xf] %vm1378_vm7, %v1374_v62 }
 0x3ab   :  { %1555 = shalt.err (!%p1552_p5)
}
 0x3ac   :  { %1390 = dma.vmem_to_hbm [thread:$0]  %s1388_s5, 64, %s2011_s3, [#allocation4]  }
 0x3ad   :  { %1568 = dma.done.wait [#allocation4], 64  }
 0x3ae   :  { %1569 = vsyncadd [#allocation4], 4294967232 }
 0x3af   :  { %1394 = vsyncpa [#allocation3], 1 }
 0x3b0   :  { %1395 = vsyncpa [#allocation6], 1 }
 0x3b1   :  { %1396 = vsyncpa [#allocation4], 1 }

// kernel: tpu_custom_call.1
= control target key start
LH: loop header
LB: loop body
LE: loop exit
PB: predicated region body
PF: predicated region fallthrough
CT: control target
= control target key end

     0   :  { %vm26_vm0 = vcmask 130048   ;;  %vm136_vm1 = vcmask 261120   ;;  %s454_s1 = inlined_call_operand.vmem [shape: f32[1,32,16], index: 1, kind: input, shape index: {}]   ;;  %s455_s0 = inlined_call_operand.vmem [shape: f32[1,32,16], index: 0, kind: input, shape index: {}]   ;;  %s456_s2 = inlined_call_operand.vmem [shape: f32[1,32,16], index: 2, kind: input, shape index: {}]   ;;  %s457_s3 = inlined_call_operand.vmem [shape: f32[1,32,16], index: 3, kind: output, shape index: {}]  }
   0x1   :  { %v21_v0 = vld [vmem:[%s454_s1 + $0x18] sm:$0xff]  ;;  %v20_v1 = vld [vmem:[%s454_s1 + $0x10] sm:$0xff]  ;;  %v14_v2 = vld [vmem:[%s455_s0] sm:$0xff] }
   0x2   :  { %314 = vmatprep.subr.msk.mxu0 %vm26_vm0, %v21_v0  ;;  %322 = vmatprep.mubr.msk.f32.mxu0 %vm26_vm0, %v14_v2  ;;  %v19_v3 = vld [vmem:[%s454_s1 + $0x8] sm:$0xff]  ;;  %v18_v4 = vld [vmem:[%s454_s1] sm:$0xff]  ;;  %v16_v6 = vld [vmem:[%s455_s0 + $0x10] sm:$0xff] }
   0x3   :  { %315 = vmatpush3.xpose.msk.msra.mxu0 %vm26_vm0, %v21_v0  ;;  %v15_v5 = vld [vmem:[%s455_s0 + $0x8] sm:$0xff]  ;;  %v17_v7 = vld [vmem:[%s455_s0 + $0x18] sm:$0xff]  ;;  %v24_v17 = vld [vmem:[%s456_s2 + $0x10] sm:$0xff] }
   0x4   :  { %316 = vmatprep.subr.msk.mxu0 %vm26_vm0, %v20_v1  ;;  %v25_v16 = vld [vmem:[%s456_s2 + $0x18] sm:$0xff]  ;;  %v23_v18 = vld [vmem:[%s456_s2 + $0x8] sm:$0xff]  ;;  %v22_v19 = vld [vmem:[%s456_s2] sm:$0xff] }
   0x5   :  { %328 = vmatprep.subr.mxu1 %v25_v16 }
   0x6   :  { %329 = vmatpush3.msra.mxu1 %v25_v16 }
   0x7   :  { %317 = vmatpush3.xpose.msk.msra.mxu0 %vm26_vm0, %v20_v1  ;;  %330 = vmatprep.subr.mxu1 %v24_v17 }
   0x8   :  { %318 = vmatprep.subr.msk.mxu0 %vm26_vm0, %v19_v3  ;;  %331 = vmatpush3.msra.mxu1 %v24_v17 }
   0x9   :  { %332 = vmatprep.subr.mxu1 %v23_v18 }
   0xa   :  { %333 = vmatpush3.msra.mxu1 %v23_v18 }
   0xb   :  { %319 = vmatpush3.xpose.msk.msra.mxu0 %vm26_vm0, %v19_v3  ;;  %334 = vmatprep.subr.mxu1 %v22_v19 }
   0xc   :  { %320 = vmatprep.subr.msk.mxu0 %vm26_vm0, %v18_v4  ;;  %335 = vmatpush3.msra.mxu1 %v22_v19 }
   0xf   :  { %321 = vmatpush3.xpose.msk.msra.mxu0 %vm26_vm0, %v18_v4 }
  0x12   :  { %323 = vmatmul.mubr.msk.f32.vlgmr.msra.gmra.mxu0 %vm26_vm0, %v15_v5 }
  0x13   :  { %325 = vmatprep.mubr.msk.f32.mxu0 %vm26_vm0, %v16_v6 }
  0x16   :  { %326 = vmatmul.mubr.msk.f32.gmra.mxu0 %vm26_vm0, %v17_v7 }
  0xd2   :  { %v324_v8 = vpop.f32.mrf.mxu0 }
  0xd3   :  { %v140_v13 = vsel %vm136_vm1, %v324_v8, -inf }
  0xd4   :  { %v117_v9 = vpop.f32.mrf.mxu0 }
  0xd5   :  { %v137_v10 = vsel %vm136_vm1, %v117_v9, -inf }
  0xd6   :  { %138 = vmax.xlane.f32.xlu0 %v137_v10  ;;  %v327_v11 = vpop.f32.mrf.mxu0 }
  0xd7   :  { %v146_v15 = vsel %vm136_vm1, %v327_v11, -inf }
  0xd8   :  { %v127_v12 = vpop.f32.mrf.mxu0 }
  0xd9   :  { %v143_v14 = vsel %vm136_vm1, %v127_v12, -inf }
  0xda   :  { %141 = vmax.xlane.f32.xlu0 %v140_v13  ;;  %144 = vmax.xlane.f32.xlu1 %v143_v14 }
  0xde   :  { %147 = vmax.xlane.f32.xlu1 %v146_v15 }
 0x15f   :  { %v139_v20 = vpop.xlane.xlu0 %138 }
 0x160   :  { %v149_v21 = vsub.f32 %v117_v9, %v139_v20 }
 0x162   :  { %v153_v22 = vmul.f32 1.442695, %v149_v21 }
 0x163   :  { %v142_v23 = vpop.xlane.xlu0 %141  ;;  %v145_v24 = vpop.xlane.xlu1 %144 }
 0x164   :  { %342 = vpow2.f32 %v153_v22  ;;  %v150_v25 = vsub.f32 %v324_v8, %v142_v23  ;;  %v151_v26 = vsub.f32 %v127_v12, %v145_v24 }
 0x166   :  { %v155_v27 = vmul.f32 1.442695, %v150_v25  ;;  %v157_v28 = vmul.f32 1.442695, %v151_v26 }
 0x167   :  { %v148_v29 = vpop.xlane.xlu1 %147 }
 0x168   :  { %344 = vpow2.f32 %v155_v27  ;;  %v152_v30 = vsub.f32 %v327_v11, %v148_v29 }
 0x169   :  { %346 = vpow2.f32 %v157_v28 }
 0x16a   :  { %v159_v31 = vmul.f32 1.442695, %v152_v30 }
 0x16c   :  { %348 = vpow2.f32 %v159_v31 }
 0x171   :  { %v343_v32 = vpop.eup %342 }
 0x172   :  { %336 = vmatprep.mubr.msk.f32.mxu1 %vm136_vm1, %v343_v32  ;;  %v161_v33 = vsel %vm136_vm1, %v343_v32, 0.0 }
 0x173   :  { %162 = vadd.xlane.f32.xlu0 %v161_v33 }
 0x175   :  { %v345_v34 = vpop.eup %344 }
 0x176   :  { %v347_v35 = vpop.eup %346  ;;  %337 = vmatmul.mubr.msk.f32.vlgmr.msra.gmra.mxu1 %vm136_vm1, %v345_v34  ;;  %v164_v36 = vsel %vm136_vm1, %v345_v34, 0.0 }
 0x177   :  { %165 = vadd.xlane.f32.xlu1 %v164_v36  ;;  %339 = vmatprep.mubr.msk.f32.mxu1 %vm136_vm1, %v347_v35  ;;  %v167_v37 = vsel %vm136_vm1, %v347_v35, 0.0 }
 0x178   :  { %168 = vadd.xlane.f32.xlu0 %v167_v37 }
 0x179   :  { %v349_v38 = vpop.eup %348 }
 0x17a   :  { %340 = vmatmul.mubr.msk.f32.gmra.mxu1 %vm136_vm1, %v349_v38  ;;  %v170_v39 = vsel %vm136_vm1, %v349_v38, 0.0 }
 0x17b   :  { %171 = vadd.xlane.f32.xlu1 %v170_v39 }
 0x1fc   :  { %v163_v41 = vpop.xlane.xlu0 %162 }
 0x200   :  { %v166_v40 = vpop.xlane.xlu1 %165 }
 0x201   :  { %350 = vrcp.f32 %v166_v40  ;;  %v169_v43 = vpop.xlane.xlu0 %168 }
 0x202   :  { %352 = vrcp.f32 %v163_v41 }
 0x204   :  { %v172_v42 = vpop.xlane.xlu1 %171 }
 0x205   :  { %354 = vrcp.f32 %v172_v42 }
 0x206   :  { %356 = vrcp.f32 %v169_v43 }
 0x20e   :  { %v351_v44 = vpop.eup %350 }
 0x20f   :  { %v353_v47 = vpop.eup %352 }
 0x212   :  { %v355_v50 = vpop.eup %354 }
 0x213   :  { %v357_v53 = vpop.eup %356 }
 0x236   :  { %v338_v45 = vpop.f32.mrf.mxu1 }
 0x237   :  { %v273_v46 = vmul.f32 %v351_v44, %v338_v45 }
 0x238   :  { %v251_v48 = vpop.f32.mrf.mxu1 }
 0x239   :  { %279 = vst.msk [vmem:[%s457_s3 + $0x8] sm:$0xff] %vm26_vm0, %v273_v46  ;;  %v271_v49 = vmul.f32 %v353_v47, %v251_v48 }
 0x23a   :  { %v341_v51 = vpop.f32.mrf.mxu1 }
 0x23b   :  { %278 = vst.msk [vmem:[%s457_s3] sm:$0xff] %vm26_vm0, %v271_v49  ;;  %v277_v52 = vmul.f32 %v355_v50, %v341_v51 }
 0x23c   :  { %v261_v54 = vpop.f32.mrf.mxu1 }
 0x23d   :  { %281 = vst.msk [vmem:[%s457_s3 + $0x18] sm:$0xff] %vm26_vm0, %v277_v52  ;;  %v275_v55 = vmul.f32 %v357_v53, %v261_v54 }
 0x23f   :  { %280 = vst.msk [vmem:[%s457_s3 + $0x10] sm:$0xff] %vm26_vm0, %v275_v55 }

</bundles_post_ra>
